<compile_context>
chip_gen: v6e
topology: v6e:2x2x1
jax: 0.10.0
libtpu: 0.0.40
codegen_flags: <defaults>
</compile_context>

<pallas_src>
import jax
import jax.numpy as jnp
from jax import lax
from jax.experimental import pallas as pl
from jax.experimental.pallas import tpu as pltpu


def _encoder_lstm_kernel(ids_ref, tab_ref, h0_ref, c0_ref, wih_ref, whh_ref,
                         b_ref, out_ref, hn_ref, cn_ref):
    """Single-invocation LSTM over the full sequence (no grid).

    ids_ref : (L,)        int32 token ids (SMEM)
    tab_ref : (V, 1, H)   embedding table (VMEM)
    h0_ref  : (1, H)      initial hidden
    c0_ref  : (1, H)      initial cell
    wih_ref : (H, 4H)     W_ih^T, bf16
    whh_ref : (H, 4H)     W_hh^T, bf16
    b_ref   : (1, 4H)     b_ih + b_hh, f32
    out_ref : (L, H)      per-step hidden states
    hn_ref  : (1, H)      final hidden
    cn_ref  : (1, H)      final cell
    """
    L = out_ref.shape[0]
    H = h0_ref.shape[-1]

    # In-kernel embedding gather: ids from SMEM, dynamic leading-axis row loads
    # from the VMEM table, stacked into the (L, H) embedded matrix.
    emb = jnp.concatenate([tab_ref[ids_ref[t]] for t in range(L)], axis=0)

    # Hoisted input projection for ALL timesteps: one (L,H)x(H,4H) MXU matmul,
    # bf16 operands / f32 accumulate.  (L,4H)=(8,128) f32 == exactly one vreg,
    # kept live as a value (no VMEM scratch round-trip).
    xg = jnp.dot(emb.astype(jnp.bfloat16), wih_ref[...],
                 preferred_element_type=jnp.float32) + b_ref[...]

    whh = whh_ref[...]                       # (H, 4H) bf16, loaded once
    h = h0_ref[...].astype(jnp.float32)      # (1, H)
    c = c0_ref[...].astype(jnp.float32)      # (1, H)

    hs = []
    # TODO(synk): stage W_hh in the MXU weight registers once via
    # pltpu.matmul_push_rhs / matmul_acc_lhs / matmul_pop instead of re-pushing
    # the same RHS every step; skipped here for lowering robustness.
    for t in range(L):                       # static trip count, fully unrolled
        gates = xg[t:t + 1, :] + jnp.dot(h.astype(jnp.bfloat16), whh,
                                         preferred_element_type=jnp.float32)
        # Two full-vreg EUP dispatches (sigmoid + tanh) instead of four sliced
        # ones; per-gate slices below are static lane extracts.
        sig = jax.nn.sigmoid(gates)
        tnh = jnp.tanh(gates)
        i_g = sig[:, 0 * H:1 * H]
        f_g = sig[:, 1 * H:2 * H]
        g_g = tnh[:, 2 * H:3 * H]
        o_g = sig[:, 3 * H:4 * H]
        c = f_g * c + i_g * g_g
        h = o_g * jnp.tanh(c)
        hs.append(h)

    # Single epilogue store of all per-step hidden states (no per-step vst).
    out_ref[...] = jnp.concatenate(hs, axis=0).astype(out_ref.dtype)
    hn_ref[...] = h.astype(hn_ref.dtype)
    cn_ref[...] = c.astype(cn_ref.dtype)


@jax.jit
def encoder_rnn_forward(params, input_ids, hidden):
    """Pallas equivalent of EncoderRNN.forward(input, hidden).

    `params` must come from prepare_params() (weights already transposed,
    bias fused, embedding table reshaped) so no per-call layout work remains.
    """
    tab = params["embedding"]                # (V, 1, H) f32
    H = tab.shape[-1]
    L = input_ids.shape[0]

    h0, c0 = hidden                          # each (1, 1, H)
    h0_2d = h0.reshape(1, H).astype(jnp.float32)
    c0_2d = c0.reshape(1, H).astype(jnp.float32)

    smem = pl.BlockSpec(memory_space=pltpu.MemorySpace.SMEM)
    vmem = pl.BlockSpec(memory_space=pltpu.MemorySpace.VMEM)

    # TODO(synk): for long sequences on v7x (64 MiB VMEM) add a time-chunk grid
    # axis ("arbitrary") with BlockSpecs over L and h/c carried in VMEM scratch,
    # and a leading "parallel" batch axis to use both TensorCores.  At L=8/H=32
    # everything (<1 MB) is resident and a single invocation is fastest.
    out2d, h_n, c_n = pl.pallas_call(
        _encoder_lstm_kernel,
        out_shape=(jax.ShapeDtypeStruct((L, H), jnp.float32),   # per-step h
                   jax.ShapeDtypeStruct((1, H), jnp.float32),   # h_n
                   jax.ShapeDtypeStruct((1, H), jnp.float32)),  # c_n
        in_specs=[smem, vmem, vmem, vmem, vmem, vmem, vmem],
        out_specs=(vmem, vmem, vmem),
    )(input_ids.astype(jnp.int32), tab, h0_2d, c0_2d,
      params["w_ih_t"], params["w_hh_t"], params["bias"])

    output = out2d.reshape(L, 1, H)
    return output, (h_n.reshape(1, 1, H), c_n.reshape(1, 1, H))


def prepare_params(raw):
    """One-time conversion to the kernel's compute layout (done at parameter
    load time, NOT per forward call)."""
    V, H = raw["embedding"].shape
    return {
        "embedding": raw["embedding"].astype(jnp.float32).reshape(V, 1, H),
        "w_ih_t": raw["w_ih"].T.astype(jnp.bfloat16),        # (H, 4H)
        "w_hh_t": raw["w_hh"].T.astype(jnp.bfloat16),        # (H, 4H)
        "bias": (raw["b_ih"] + raw["b_hh"]).reshape(1, 4 * H).astype(jnp.float32),
    }


def ref_forward(raw, input_ids, hidden):
    """Pure-JAX f32 reference of the PyTorch forward semantics."""
    emb_table = raw["embedding"]
    H = emb_table.shape[1]
    emb = emb_table[input_ids].astype(jnp.float32)           # (L, H)
    h = hidden[0].reshape(1, H)
    c = hidden[1].reshape(1, H)
    wih_t = raw["w_ih"].T
    whh_t = raw["w_hh"].T
    b = raw["b_ih"] + raw["b_hh"]
    x_gates = emb @ wih_t + b                                 # (L, 4H)

    def step(carry, xg):
        h, c = carry
        gates = xg[None, :] + h @ whh_t
        i = jax.nn.sigmoid(gates[:, 0 * H:1 * H])
        f = jax.nn.sigmoid(gates[:, 1 * H:2 * H])
        g = jnp.tanh(gates[:, 2 * H:3 * H])
        o = jax.nn.sigmoid(gates[:, 3 * H:4 * H])
        c = f * c + i * g
        h = o * jnp.tanh(c)
        return (h, c), h[0]

    (h, c), ys = lax.scan(step, (h, c), x_gates)
    return ys[:, None, :], (h[None], c[None])


def init_params(key, num_of_word, hidden_size):
    """Deterministic init matching PyTorch shapes (embedding ~N(0,1), LSTM ~U(-k,k))."""
    k_emb, k_wih, k_whh, k_bih, k_bhh = jax.random.split(key, 5)
    k = 1.0 / jnp.sqrt(hidden_size)
    return {
        "embedding": jax.random.normal(k_emb, (num_of_word, hidden_size),
                                       jnp.float32),
        "w_ih": jax.random.uniform(k_wih, (4 * hidden_size, hidden_size),
                                   jnp.float32, -k, k),
        "w_hh": jax.random.uniform(k_whh, (4 * hidden_size, hidden_size),
                                   jnp.float32, -k, k),
        "b_ih": jax.random.uniform(k_bih, (4 * hidden_size,),
                                   jnp.float32, -k, k),
        "b_hh": jax.random.uniform(k_bhh, (4 * hidden_size,),
                                   jnp.float32, -k, k),
    }


if __name__ == "__main__":
    num_of_word = 50
    hidden_size = 32
    seq_len = 8

    key = jax.random.PRNGKey(0)
    k_params, k_ids, k_h, k_c = jax.random.split(key, 4)

    raw_params = init_params(k_params, num_of_word, hidden_size)
    params = prepare_params(raw_params)

    input_ids = jax.random.randint(k_ids, (seq_len,), 0, num_of_word,
                                   dtype=jnp.int32)
    h0 = jax.random.normal(k_h, (1, 1, hidden_size), jnp.float32)
    c0 = jax.random.normal(k_c, (1, 1, hidden_size), jnp.float32)

    output, (h_n, c_n) = encoder_rnn_forward(params, input_ids, (h0, c0))
    jax.block_until_ready((output, h_n, c_n))

    ref_out, (ref_h, ref_c) = ref_forward(raw_params, input_ids, (h0, c0))
    # Tolerance covers bf16 MXU operands (f32 accumulate) vs the f32 XLA
    # reference; real bugs (wrong gate order, stale state) give O(0.1..1) errors.
    assert jnp.allclose(output, ref_out, atol=2e-2, rtol=2e-2), (
        float(jnp.max(jnp.abs(output - ref_out))))
    assert jnp.allclose(h_n, ref_h, atol=2e-2, rtol=2e-2)
    assert jnp.allclose(c_n, ref_c, atol=2e-2, rtol=2e-2)

    print("KERNEL_OK")
</pallas_src>

<mosaic_0001>
module attributes {stable_mosaic.version = 11 : i64} {
  func.func @_encoder_lstm_kernel(%arg0: memref<8xi32, #tpu.memory_space<smem>>, %arg1: memref<50x1x32xf32, #tpu.memory_space<vmem>>, %arg2: memref<1x32xf32, #tpu.memory_space<vmem>>, %arg3: memref<1x32xf32, #tpu.memory_space<vmem>>, %arg4: memref<32x128xbf16, #tpu.memory_space<vmem>>, %arg5: memref<32x128xbf16, #tpu.memory_space<vmem>>, %arg6: memref<1x128xf32, #tpu.memory_space<vmem>>, %arg7: memref<8x32xf32, #tpu.memory_space<vmem>>, %arg8: memref<1x32xf32, #tpu.memory_space<vmem>>, %arg9: memref<1x32xf32, #tpu.memory_space<vmem>>) attributes {dimension_semantics = [], scalar_prefetch = 0 : i64, scratch_operands = 0 : i64, tpu.core_type = #tpu.core_type<tc>} {
    %c0 = arith.constant 0 : index
    %0 = memref.load %arg0[%c0] : memref<8xi32, #tpu.memory_space<smem>>
    %1 = arith.index_cast %0 : i32 to index
    %c0_0 = arith.constant 0 : index
    %c0_1 = arith.constant 0 : index
    %2 = vector.load %arg1[%1, %c0_0, %c0_1] : memref<50x1x32xf32, #tpu.memory_space<vmem>>, vector<1x1x32xf32>
    %3 = vector.shape_cast %2 : vector<1x1x32xf32> to vector<1x32xf32>
    %c1 = arith.constant 1 : index
    %4 = memref.load %arg0[%c1] : memref<8xi32, #tpu.memory_space<smem>>
    %5 = arith.index_cast %4 : i32 to index
    %c0_2 = arith.constant 0 : index
    %c0_3 = arith.constant 0 : index
    %6 = vector.load %arg1[%5, %c0_2, %c0_3] : memref<50x1x32xf32, #tpu.memory_space<vmem>>, vector<1x1x32xf32>
    %7 = vector.shape_cast %6 : vector<1x1x32xf32> to vector<1x32xf32>
    %c2 = arith.constant 2 : index
    %8 = memref.load %arg0[%c2] : memref<8xi32, #tpu.memory_space<smem>>
    %9 = arith.index_cast %8 : i32 to index
    %c0_4 = arith.constant 0 : index
    %c0_5 = arith.constant 0 : index
    %10 = vector.load %arg1[%9, %c0_4, %c0_5] : memref<50x1x32xf32, #tpu.memory_space<vmem>>, vector<1x1x32xf32>
    %11 = vector.shape_cast %10 : vector<1x1x32xf32> to vector<1x32xf32>
    %c3 = arith.constant 3 : index
    %12 = memref.load %arg0[%c3] : memref<8xi32, #tpu.memory_space<smem>>
    %13 = arith.index_cast %12 : i32 to index
    %c0_6 = arith.constant 0 : index
    %c0_7 = arith.constant 0 : index
    %14 = vector.load %arg1[%13, %c0_6, %c0_7] : memref<50x1x32xf32, #tpu.memory_space<vmem>>, vector<1x1x32xf32>
    %15 = vector.shape_cast %14 : vector<1x1x32xf32> to vector<1x32xf32>
    %c4 = arith.constant 4 : index
    %16 = memref.load %arg0[%c4] : memref<8xi32, #tpu.memory_space<smem>>
    %17 = arith.index_cast %16 : i32 to index
    %c0_8 = arith.constant 0 : index
    %c0_9 = arith.constant 0 : index
    %18 = vector.load %arg1[%17, %c0_8, %c0_9] : memref<50x1x32xf32, #tpu.memory_space<vmem>>, vector<1x1x32xf32>
    %19 = vector.shape_cast %18 : vector<1x1x32xf32> to vector<1x32xf32>
    %c5 = arith.constant 5 : index
    %20 = memref.load %arg0[%c5] : memref<8xi32, #tpu.memory_space<smem>>
    %21 = arith.index_cast %20 : i32 to index
    %c0_10 = arith.constant 0 : index
    %c0_11 = arith.constant 0 : index
    %22 = vector.load %arg1[%21, %c0_10, %c0_11] : memref<50x1x32xf32, #tpu.memory_space<vmem>>, vector<1x1x32xf32>
    %23 = vector.shape_cast %22 : vector<1x1x32xf32> to vector<1x32xf32>
    %c6 = arith.constant 6 : index
    %24 = memref.load %arg0[%c6] : memref<8xi32, #tpu.memory_space<smem>>
    %25 = arith.index_cast %24 : i32 to index
    %c0_12 = arith.constant 0 : index
    %c0_13 = arith.constant 0 : index
    %26 = vector.load %arg1[%25, %c0_12, %c0_13] : memref<50x1x32xf32, #tpu.memory_space<vmem>>, vector<1x1x32xf32>
    %27 = vector.shape_cast %26 : vector<1x1x32xf32> to vector<1x32xf32>
    %c7 = arith.constant 7 : index
    %28 = memref.load %arg0[%c7] : memref<8xi32, #tpu.memory_space<smem>>
    %29 = arith.index_cast %28 : i32 to index
    %c0_14 = arith.constant 0 : index
    %c0_15 = arith.constant 0 : index
    %30 = vector.load %arg1[%29, %c0_14, %c0_15] : memref<50x1x32xf32, #tpu.memory_space<vmem>>, vector<1x1x32xf32>
    %31 = vector.shape_cast %30 : vector<1x1x32xf32> to vector<1x32xf32>
    %32 = tpu.concatenate %3, %7, %11, %15, %19, %23, %27, %31 in 0 : vector<1x32xf32>, vector<1x32xf32>, vector<1x32xf32>, vector<1x32xf32>, vector<1x32xf32>, vector<1x32xf32>, vector<1x32xf32>, vector<1x32xf32> -> vector<8x32xf32>
    %33 = arith.truncf %32 : vector<8x32xf32> to vector<8x32xbf16>
    %c0_16 = arith.constant 0 : index
    %c0_17 = arith.constant 0 : index
    %34 = vector.load %arg4[%c0_16, %c0_17] : memref<32x128xbf16, #tpu.memory_space<vmem>>, vector<32x128xbf16>
    %cst = arith.constant dense<0.000000e+00> : vector<8x128xf32>
    %35 = tpu.matmul %33, %34, %cst {dimension_numbers = #tpu.dot_dimension_numbers<[1], [0], [0], [1], [0, 0, 1, 1], [], []>} : vector<8x32xbf16>, vector<32x128xbf16>, vector<8x128xf32> -> vector<8x128xf32>
    %c0_18 = arith.constant 0 : index
    %c0_19 = arith.constant 0 : index
    %36 = vector.load %arg6[%c0_18, %c0_19] : memref<1x128xf32, #tpu.memory_space<vmem>>, vector<1x128xf32>
    %37 = vector.broadcast %36 : vector<1x128xf32> to vector<8x128xf32>
    %38 = arith.addf %35, %37 : vector<8x128xf32>
    %c0_20 = arith.constant 0 : index
    %c0_21 = arith.constant 0 : index
    %39 = vector.load %arg5[%c0_20, %c0_21] : memref<32x128xbf16, #tpu.memory_space<vmem>>, vector<32x128xbf16>
    %c0_22 = arith.constant 0 : index
    %c0_23 = arith.constant 0 : index
    %40 = vector.load %arg2[%c0_22, %c0_23] : memref<1x32xf32, #tpu.memory_space<vmem>>, vector<1x32xf32>
    %c0_24 = arith.constant 0 : index
    %c0_25 = arith.constant 0 : index
    %41 = vector.load %arg3[%c0_24, %c0_25] : memref<1x32xf32, #tpu.memory_space<vmem>>, vector<1x32xf32>
    %42 = vector.extract_strided_slice %38 {offsets = [0, 0], sizes = [1, 128], strides = [1, 1]} : vector<8x128xf32> to vector<1x128xf32>
    %43 = arith.truncf %40 : vector<1x32xf32> to vector<1x32xbf16>
    %cst_26 = arith.constant dense<0.000000e+00> : vector<1x128xf32>
    %44 = tpu.matmul %43, %39, %cst_26 {dimension_numbers = #tpu.dot_dimension_numbers<[1], [0], [0], [1], [0, 0, 1, 1], [], []>} : vector<1x32xbf16>, vector<32x128xbf16>, vector<1x128xf32> -> vector<1x128xf32>
    %45 = arith.addf %42, %44 : vector<1x128xf32>
    %46 = arith.negf %45 : vector<1x128xf32>
    %47 = math.exp %46 : vector<1x128xf32>
    %cst_27 = arith.constant 1.000000e+00 : f32
    %48 = vector.broadcast %cst_27 : f32 to vector<1x128xf32>
    %49 = arith.addf %48, %47 : vector<1x128xf32>
    %50 = arith.divf %48, %49 : vector<1x128xf32>
    %51 = math.tanh %45 : vector<1x128xf32>
    %52 = vector.extract_strided_slice %50 {offsets = [0, 0], sizes = [1, 32], strides = [1, 1]} : vector<1x128xf32> to vector<1x32xf32>
    %53 = vector.extract_strided_slice %50 {offsets = [0, 32], sizes = [1, 32], strides = [1, 1]} : vector<1x128xf32> to vector<1x32xf32>
    %54 = vector.extract_strided_slice %51 {offsets = [0, 64], sizes = [1, 32], strides = [1, 1]} : vector<1x128xf32> to vector<1x32xf32>
    %55 = vector.extract_strided_slice %50 {offsets = [0, 96], sizes = [1, 32], strides = [1, 1]} : vector<1x128xf32> to vector<1x32xf32>
    %56 = arith.mulf %53, %41 : vector<1x32xf32>
    %57 = arith.mulf %52, %54 : vector<1x32xf32>
    %58 = arith.addf %56, %57 : vector<1x32xf32>
    %59 = math.tanh %58 : vector<1x32xf32>
    %60 = arith.mulf %55, %59 : vector<1x32xf32>
    %61 = vector.extract_strided_slice %38 {offsets = [1, 0], sizes = [1, 128], strides = [1, 1]} : vector<8x128xf32> to vector<1x128xf32>
    %62 = arith.truncf %60 : vector<1x32xf32> to vector<1x32xbf16>
    %cst_28 = arith.constant dense<0.000000e+00> : vector<1x128xf32>
    %63 = tpu.matmul %62, %39, %cst_28 {dimension_numbers = #tpu.dot_dimension_numbers<[1], [0], [0], [1], [0, 0, 1, 1], [], []>} : vector<1x32xbf16>, vector<32x128xbf16>, vector<1x128xf32> -> vector<1x128xf32>
    %64 = arith.addf %61, %63 : vector<1x128xf32>
    %65 = arith.negf %64 : vector<1x128xf32>
    %66 = math.exp %65 : vector<1x128xf32>
    %cst_29 = arith.constant 1.000000e+00 : f32
    %67 = vector.broadcast %cst_29 : f32 to vector<1x128xf32>
    %68 = arith.addf %67, %66 : vector<1x128xf32>
    %69 = arith.divf %67, %68 : vector<1x128xf32>
    %70 = math.tanh %64 : vector<1x128xf32>
    %71 = vector.extract_strided_slice %69 {offsets = [0, 0], sizes = [1, 32], strides = [1, 1]} : vector<1x128xf32> to vector<1x32xf32>
    %72 = vector.extract_strided_slice %69 {offsets = [0, 32], sizes = [1, 32], strides = [1, 1]} : vector<1x128xf32> to vector<1x32xf32>
    %73 = vector.extract_strided_slice %70 {offsets = [0, 64], sizes = [1, 32], strides = [1, 1]} : vector<1x128xf32> to vector<1x32xf32>
    %74 = vector.extract_strided_slice %69 {offsets = [0, 96], sizes = [1, 32], strides = [1, 1]} : vector<1x128xf32> to vector<1x32xf32>
    %75 = arith.mulf %72, %58 : vector<1x32xf32>
    %76 = arith.mulf %71, %73 : vector<1x32xf32>
    %77 = arith.addf %75, %76 : vector<1x32xf32>
    %78 = math.tanh %77 : vector<1x32xf32>
    %79 = arith.mulf %74, %78 : vector<1x32xf32>
    %80 = vector.extract_strided_slice %38 {offsets = [2, 0], sizes = [1, 128], strides = [1, 1]} : vector<8x128xf32> to vector<1x128xf32>
    %81 = arith.truncf %79 : vector<1x32xf32> to vector<1x32xbf16>
    %cst_30 = arith.constant dense<0.000000e+00> : vector<1x128xf32>
    %82 = tpu.matmul %81, %39, %cst_30 {dimension_numbers = #tpu.dot_dimension_numbers<[1], [0], [0], [1], [0, 0, 1, 1], [], []>} : vector<1x32xbf16>, vector<32x128xbf16>, vector<1x128xf32> -> vector<1x128xf32>
    %83 = arith.addf %80, %82 : vector<1x128xf32>
    %84 = arith.negf %83 : vector<1x128xf32>
    %85 = math.exp %84 : vector<1x128xf32>
    %cst_31 = arith.constant 1.000000e+00 : f32
    %86 = vector.broadcast %cst_31 : f32 to vector<1x128xf32>
    %87 = arith.addf %86, %85 : vector<1x128xf32>
    %88 = arith.divf %86, %87 : vector<1x128xf32>
    %89 = math.tanh %83 : vector<1x128xf32>
    %90 = vector.extract_strided_slice %88 {offsets = [0, 0], sizes = [1, 32], strides = [1, 1]} : vector<1x128xf32> to vector<1x32xf32>
    %91 = vector.extract_strided_slice %88 {offsets = [0, 32], sizes = [1, 32], strides = [1, 1]} : vector<1x128xf32> to vector<1x32xf32>
    %92 = vector.extract_strided_slice %89 {offsets = [0, 64], sizes = [1, 32], strides = [1, 1]} : vector<1x128xf32> to vector<1x32xf32>
    %93 = vector.extract_strided_slice %88 {offsets = [0, 96], sizes = [1, 32], strides = [1, 1]} : vector<1x128xf32> to vector<1x32xf32>
    %94 = arith.mulf %91, %77 : vector<1x32xf32>
    %95 = arith.mulf %90, %92 : vector<1x32xf32>
    %96 = arith.addf %94, %95 : vector<1x32xf32>
    %97 = math.tanh %96 : vector<1x32xf32>
    %98 = arith.mulf %93, %97 : vector<1x32xf32>
    %99 = vector.extract_strided_slice %38 {offsets = [3, 0], sizes = [1, 128], strides = [1, 1]} : vector<8x128xf32> to vector<1x128xf32>
    %100 = arith.truncf %98 : vector<1x32xf32> to vector<1x32xbf16>
    %cst_32 = arith.constant dense<0.000000e+00> : vector<1x128xf32>
    %101 = tpu.matmul %100, %39, %cst_32 {dimension_numbers = #tpu.dot_dimension_numbers<[1], [0], [0], [1], [0, 0, 1, 1], [], []>} : vector<1x32xbf16>, vector<32x128xbf16>, vector<1x128xf32> -> vector<1x128xf32>
    %102 = arith.addf %99, %101 : vector<1x128xf32>
    %103 = arith.negf %102 : vector<1x128xf32>
    %104 = math.exp %103 : vector<1x128xf32>
    %cst_33 = arith.constant 1.000000e+00 : f32
    %105 = vector.broadcast %cst_33 : f32 to vector<1x128xf32>
    %106 = arith.addf %105, %104 : vector<1x128xf32>
    %107 = arith.divf %105, %106 : vector<1x128xf32>
    %108 = math.tanh %102 : vector<1x128xf32>
    %109 = vector.extract_strided_slice %107 {offsets = [0, 0], sizes = [1, 32], strides = [1, 1]} : vector<1x128xf32> to vector<1x32xf32>
    %110 = vector.extract_strided_slice %107 {offsets = [0, 32], sizes = [1, 32], strides = [1, 1]} : vector<1x128xf32> to vector<1x32xf32>
    %111 = vector.extract_strided_slice %108 {offsets = [0, 64], sizes = [1, 32], strides = [1, 1]} : vector<1x128xf32> to vector<1x32xf32>
    %112 = vector.extract_strided_slice %107 {offsets = [0, 96], sizes = [1, 32], strides = [1, 1]} : vector<1x128xf32> to vector<1x32xf32>
    %113 = arith.mulf %110, %96 : vector<1x32xf32>
    %114 = arith.mulf %109, %111 : vector<1x32xf32>
    %115 = arith.addf %113, %114 : vector<1x32xf32>
    %116 = math.tanh %115 : vector<1x32xf32>
    %117 = arith.mulf %112, %116 : vector<1x32xf32>
    %118 = vector.extract_strided_slice %38 {offsets = [4, 0], sizes = [1, 128], strides = [1, 1]} : vector<8x128xf32> to vector<1x128xf32>
    %119 = arith.truncf %117 : vector<1x32xf32> to vector<1x32xbf16>
    %cst_34 = arith.constant dense<0.000000e+00> : vector<1x128xf32>
    %120 = tpu.matmul %119, %39, %cst_34 {dimension_numbers = #tpu.dot_dimension_numbers<[1], [0], [0], [1], [0, 0, 1, 1], [], []>} : vector<1x32xbf16>, vector<32x128xbf16>, vector<1x128xf32> -> vector<1x128xf32>
    %121 = arith.addf %118, %120 : vector<1x128xf32>
    %122 = arith.negf %121 : vector<1x128xf32>
    %123 = math.exp %122 : vector<1x128xf32>
    %cst_35 = arith.constant 1.000000e+00 : f32
    %124 = vector.broadcast %cst_35 : f32 to vector<1x128xf32>
    %125 = arith.addf %124, %123 : vector<1x128xf32>
    %126 = arith.divf %124, %125 : vector<1x128xf32>
    %127 = math.tanh %121 : vector<1x128xf32>
    %128 = vector.extract_strided_slice %126 {offsets = [0, 0], sizes = [1, 32], strides = [1, 1]} : vector<1x128xf32> to vector<1x32xf32>
    %129 = vector.extract_strided_slice %126 {offsets = [0, 32], sizes = [1, 32], strides = [1, 1]} : vector<1x128xf32> to vector<1x32xf32>
    %130 = vector.extract_strided_slice %127 {offsets = [0, 64], sizes = [1, 32], strides = [1, 1]} : vector<1x128xf32> to vector<1x32xf32>
    %131 = vector.extract_strided_slice %126 {offsets = [0, 96], sizes = [1, 32], strides = [1, 1]} : vector<1x128xf32> to vector<1x32xf32>
    %132 = arith.mulf %129, %115 : vector<1x32xf32>
    %133 = arith.mulf %128, %130 : vector<1x32xf32>
    %134 = arith.addf %132, %133 : vector<1x32xf32>
    %135 = math.tanh %134 : vector<1x32xf32>
    %136 = arith.mulf %131, %135 : vector<1x32xf32>
    %137 = vector.extract_strided_slice %38 {offsets = [5, 0], sizes = [1, 128], strides = [1, 1]} : vector<8x128xf32> to vector<1x128xf32>
    %138 = arith.truncf %136 : vector<1x32xf32> to vector<1x32xbf16>
    %cst_36 = arith.constant dense<0.000000e+00> : vector<1x128xf32>
    %139 = tpu.matmul %138, %39, %cst_36 {dimension_numbers = #tpu.dot_dimension_numbers<[1], [0], [0], [1], [0, 0, 1, 1], [], []>} : vector<1x32xbf16>, vector<32x128xbf16>, vector<1x128xf32> -> vector<1x128xf32>
    %140 = arith.addf %137, %139 : vector<1x128xf32>
    %141 = arith.negf %140 : vector<1x128xf32>
    %142 = math.exp %141 : vector<1x128xf32>
    %cst_37 = arith.constant 1.000000e+00 : f32
    %143 = vector.broadcast %cst_37 : f32 to vector<1x128xf32>
    %144 = arith.addf %143, %142 : vector<1x128xf32>
    %145 = arith.divf %143, %144 : vector<1x128xf32>
    %146 = math.tanh %140 : vector<1x128xf32>
    %147 = vector.extract_strided_slice %145 {offsets = [0, 0], sizes = [1, 32], strides = [1, 1]} : vector<1x128xf32> to vector<1x32xf32>
    %148 = vector.extract_strided_slice %145 {offsets = [0, 32], sizes = [1, 32], strides = [1, 1]} : vector<1x128xf32> to vector<1x32xf32>
    %149 = vector.extract_strided_slice %146 {offsets = [0, 64], sizes = [1, 32], strides = [1, 1]} : vector<1x128xf32> to vector<1x32xf32>
    %150 = vector.extract_strided_slice %145 {offsets = [0, 96], sizes = [1, 32], strides = [1, 1]} : vector<1x128xf32> to vector<1x32xf32>
    %151 = arith.mulf %148, %134 : vector<1x32xf32>
    %152 = arith.mulf %147, %149 : vector<1x32xf32>
    %153 = arith.addf %151, %152 : vector<1x32xf32>
    %154 = math.tanh %153 : vector<1x32xf32>
    %155 = arith.mulf %150, %154 : vector<1x32xf32>
    %156 = vector.extract_strided_slice %38 {offsets = [6, 0], sizes = [1, 128], strides = [1, 1]} : vector<8x128xf32> to vector<1x128xf32>
    %157 = arith.truncf %155 : vector<1x32xf32> to vector<1x32xbf16>
    %cst_38 = arith.constant dense<0.000000e+00> : vector<1x128xf32>
    %158 = tpu.matmul %157, %39, %cst_38 {dimension_numbers = #tpu.dot_dimension_numbers<[1], [0], [0], [1], [0, 0, 1, 1], [], []>} : vector<1x32xbf16>, vector<32x128xbf16>, vector<1x128xf32> -> vector<1x128xf32>
    %159 = arith.addf %156, %158 : vector<1x128xf32>
    %160 = arith.negf %159 : vector<1x128xf32>
    %161 = math.exp %160 : vector<1x128xf32>
    %cst_39 = arith.constant 1.000000e+00 : f32
    %162 = vector.broadcast %cst_39 : f32 to vector<1x128xf32>
    %163 = arith.addf %162, %161 : vector<1x128xf32>
    %164 = arith.divf %162, %163 : vector<1x128xf32>
    %165 = math.tanh %159 : vector<1x128xf32>
    %166 = vector.extract_strided_slice %164 {offsets = [0, 0], sizes = [1, 32], strides = [1, 1]} : vector<1x128xf32> to vector<1x32xf32>
    %167 = vector.extract_strided_slice %164 {offsets = [0, 32], sizes = [1, 32], strides = [1, 1]} : vector<1x128xf32> to vector<1x32xf32>
    %168 = vector.extract_strided_slice %165 {offsets = [0, 64], sizes = [1, 32], strides = [1, 1]} : vector<1x128xf32> to vector<1x32xf32>
    %169 = vector.extract_strided_slice %164 {offsets = [0, 96], sizes = [1, 32], strides = [1, 1]} : vector<1x128xf32> to vector<1x32xf32>
    %170 = arith.mulf %167, %153 : vector<1x32xf32>
    %171 = arith.mulf %166, %168 : vector<1x32xf32>
    %172 = arith.addf %170, %171 : vector<1x32xf32>
    %173 = math.tanh %172 : vector<1x32xf32>
    %174 = arith.mulf %169, %173 : vector<1x32xf32>
    %175 = vector.extract_strided_slice %38 {offsets = [7, 0], sizes = [1, 128], strides = [1, 1]} : vector<8x128xf32> to vector<1x128xf32>
    %176 = arith.truncf %174 : vector<1x32xf32> to vector<1x32xbf16>
    %cst_40 = arith.constant dense<0.000000e+00> : vector<1x128xf32>
    %177 = tpu.matmul %176, %39, %cst_40 {dimension_numbers = #tpu.dot_dimension_numbers<[1], [0], [0], [1], [0, 0, 1, 1], [], []>} : vector<1x32xbf16>, vector<32x128xbf16>, vector<1x128xf32> -> vector<1x128xf32>
    %178 = arith.addf %175, %177 : vector<1x128xf32>
    %179 = arith.negf %178 : vector<1x128xf32>
    %180 = math.exp %179 : vector<1x128xf32>
    %cst_41 = arith.constant 1.000000e+00 : f32
    %181 = vector.broadcast %cst_41 : f32 to vector<1x128xf32>
    %182 = arith.addf %181, %180 : vector<1x128xf32>
    %183 = arith.divf %181, %182 : vector<1x128xf32>
    %184 = math.tanh %178 : vector<1x128xf32>
    %185 = vector.extract_strided_slice %183 {offsets = [0, 0], sizes = [1, 32], strides = [1, 1]} : vector<1x128xf32> to vector<1x32xf32>
    %186 = vector.extract_strided_slice %183 {offsets = [0, 32], sizes = [1, 32], strides = [1, 1]} : vector<1x128xf32> to vector<1x32xf32>
    %187 = vector.extract_strided_slice %184 {offsets = [0, 64], sizes = [1, 32], strides = [1, 1]} : vector<1x128xf32> to vector<1x32xf32>
    %188 = vector.extract_strided_slice %183 {offsets = [0, 96], sizes = [1, 32], strides = [1, 1]} : vector<1x128xf32> to vector<1x32xf32>
    %189 = arith.mulf %186, %172 : vector<1x32xf32>
    %190 = arith.mulf %185, %187 : vector<1x32xf32>
    %191 = arith.addf %189, %190 : vector<1x32xf32>
    %192 = math.tanh %191 : vector<1x32xf32>
    %193 = arith.mulf %188, %192 : vector<1x32xf32>
    %194 = tpu.concatenate %60, %79, %98, %117, %136, %155, %174, %193 in 0 : vector<1x32xf32>, vector<1x32xf32>, vector<1x32xf32>, vector<1x32xf32>, vector<1x32xf32>, vector<1x32xf32>, vector<1x32xf32>, vector<1x32xf32> -> vector<8x32xf32>
    %c0_42 = arith.constant 0 : index
    %c0_43 = arith.constant 0 : index
    %195 = vector.load %arg7[%c0_42, %c0_43] : memref<8x32xf32, #tpu.memory_space<vmem>>, vector<8x32xf32>
    tpu.vector_store %arg7[%c0_42, %c0_43], %194 {strides = array<i32>} : memref<8x32xf32, #tpu.memory_space<vmem>>, vector<8x32xf32>,
    %c0_44 = arith.constant 0 : index
    %c0_45 = arith.constant 0 : index
    %196 = vector.load %arg8[%c0_44, %c0_45] : memref<1x32xf32, #tpu.memory_space<vmem>>, vector<1x32xf32>
    tpu.vector_store %arg8[%c0_44, %c0_45], %193 {strides = array<i32>} : memref<1x32xf32, #tpu.memory_space<vmem>>, vector<1x32xf32>,
    %c0_46 = arith.constant 0 : index
    %c0_47 = arith.constant 0 : index
    %197 = vector.load %arg9[%c0_46, %c0_47] : memref<1x32xf32, #tpu.memory_space<vmem>>, vector<1x32xf32>
    tpu.vector_store %arg9[%c0_46, %c0_47], %191 {strides = array<i32>} : memref<1x32xf32, #tpu.memory_space<vmem>>, vector<1x32xf32>,
    return
  }
}

</mosaic_0001>

<bundles_post_ra>
// kernel: encoder_rnn_forward.1
= control target key start
LH: loop header
LB: loop body
LE: loop exit
PB: predicated region body
PF: predicated region fallthrough
CT: control target
= control target key end

     0   :  { %15 = vsyncpa [#allocation4], 0  ;;  %s1467_s0 = inlined_call_operand.vmem [shape: s32[8], index: 0, kind: input, shape index: {}]   ;;  %s1468_s1 = inlined_call_operand.vmem [shape: f32[50,1,32], index: 1, kind: input, shape index: {}]   ;;  %s1469_s2 = inlined_call_operand.vmem [shape: f32[1,32], index: 2, kind: input, shape index: {}]   ;;  %s1470_s3 = inlined_call_operand.vmem [shape: f32[1,32], index: 3, kind: input, shape index: {}]   ;;  %s1471_s4 = inlined_call_operand.vmem [shape: bf16[32,128], index: 4, kind: input, shape index: {}]   ;;  %s1472_s5 = inlined_call_operand.vmem [shape: bf16[32,128], index: 5, kind: input, shape index: {}]   ;;  %s1473_s6 = inlined_call_operand.vmem [shape: f32[1,128], index: 6, kind: input, shape index: {}]   ;;  %s1474_s7 = inlined_call_operand.hbm [shape: f32[8,32], index: 7, kind: output, shape index: {0}]   ;;  %s1475_s8 = inlined_call_operand.hbm [shape: f32[1,32], index: 8, kind: output, shape index: {1}]   ;;  %s1476_s9 = inlined_call_operand.hbm [shape: f32[1,32], index: 9, kind: output, shape index: {2}]  }
   0x1   :  { %16 = vsyncpa [#allocation3], 0 }
   0x2   :  { %17 = vsyncpa [#allocation7], 0  ;;  %s24_s11 = sshll.u32 %s1467_s0, 4  ;;  %s25_s11 = int_to_ptr.vmem [resolvable:$true] %s24_s11 }
   0x3   :  { %s1131_s12 = scalar_lea.vmem %s25_s11, 16  ;;  %p1136_p1 = scmp.lt.s32.totalorder %s25_s11, %s25_s11 }
   0x4   :  { %p1132_p0 = scmp.ne.s32.totalorder %s25_s11, %s1131_s12  ;;  %p1137_p2 = scmp.lt.s32.totalorder %s1131_s12, %s1131_s12 }
   0x6   :  { %p1138_p3 = por %p1137_p2, %p1136_p1 }
   0x8   :  { %p1139_p4 = pnand %p1138_p3, %p1132_p0 }
   0xa   :  { %1142 = shalt.err (!%p1139_p4)
}
   0xb   :  { %s1209_s13 = smov [#allocation2]  }
   0xc   :  { %27 = dma.vmem_to_smem %s25_s11, 16, %s1209_s13, [#allocation4]  }
   0xd   :  { %1203 = dma.done.wait [#allocation4], 16  }
   0xe   :  { %1204 = vsyncadd [#allocation4], 4294967280 }
   0xf   :  { %43 = sfence }
  0x10   :  { %v1274_v0 = vld [vmem:[%s1472_s5 + $0x8] sm:$0xff]   ;;  %v1210_v1 = vmov 0.0   ;;  %v1285_v3 = vld [vmem:[%s1472_s5] sm:$0xff]   ;;  %vm1211_vm0 = vmmov 0   ;;  %s45_s5 = sld [smem:[#allocation2]]  ;;  %vm149_vm1 = vcmask 261120  }
  0x11   :  { %990 = vmatprep.subr.bf16.mxu1 %v1210_v1  ;;  %982 = vmatprep.subr.bf16.mxu0 %v1210_v1  ;;  %v1064_v2 = vld [vmem:[%s1471_s4 + $0x8] sm:$0xff]   ;;  %v197_v4 = vld [vmem:[%s1469_s2] sm:$0x1]  ;;  %s918_s23 = sld [smem:[#allocation2 + $0x1]]  ;;  %vm111_vm2 = vcmask 1040384   ;;  %vm113_vm3 = vcmask 1041408  }
  0x12   :  { %991 = vmatpush3.bf16.msra.mxu1 %v1274_v0  ;;  %994 = vmatprep.mubr.msk.bf16.mxu1 %vm1211_vm0, %v1210_v1  ;;  %v1066_v5 = vld [vmem:[%s1471_s4] sm:$0xff]   ;;  %v199_v6 = vpack.c.bf16 %v197_v4, %v197_v4  ;;  %s919_s24 = sld [smem:[#allocation2 + $0x2]]  ;;  %vm115_vm4 = vcmask 1042432   ;;  %vm117_vm5 = vcmask 1043456   ;;  %vm119_vm6 = vcmask 1044480   ;;  %s1213_s10 = smov 32  }
  0x13   :  { %992 = vmatprep.subr.bf16.mxu1 %v1210_v1  ;;  %983 = vmatpush3.bf16.msra.mxu0 %v1064_v2  ;;  %s920_s25 = sld [smem:[#allocation2 + $0x3]]  ;;  %vm121_vm7 = vcmask 1045504   ;;  %vm123_vm8 = vcmask 1046528   ;;  %v932_v27 = vld [vmem:[%s1473_s6] ss:$0 sm:$0xff]  ;;  %s1215_s6 = smov [#allocation6]  }
  0x14   :  { %984 = vmatprep.subr.bf16.mxu0 %v1210_v1  ;;  %986 = vmatprep.mubr.msk.bf16.mxu0 %vm1211_vm0, %v1210_v1  ;;  %s921_s2 = sld [smem:[#allocation2 + $0x4]]  ;;  %v940_v35 = vld [vmem:[%s1470_s3] ss:$0 sm:$0xff]  ;;  %s1214_s3 = smov 96   ;;  %vm861_vm9 = vcmask 261127  }
  0x15   :  { %s922_s4 = sld [smem:[#allocation2 + $0x5]]  ;;  %s1217_s14 = smov [#allocation8]  }
  0x16   :  { %993 = vmatpush3.bf16.msra.mxu1 %v1285_v3  ;;  %s46_s28 = scalar_lea.vmem %s1468_s1, %s45_s5  ;;  %s1306_s29 = sld [smem:[#allocation2 + $0x6]] }
  0x17   :  { %985 = vmatpush3.bf16.msra.mxu0 %v1066_v5  ;;  %1006 = vmatprep.subr.bf16.mxu1 %v1210_v1  ;;  %v47_v7 = vld [vmem:[%s46_s28] sm:$0x1]  ;;  %s49_s11 = scalar_lea.vmem %s1468_s1, %s918_s23  ;;  %s924_s12 = sld [smem:[#allocation2 + $0x7]] }
  0x18   :  { %998 = vmatprep.subr.bf16.mxu0 %v1210_v1  ;;  %v925_v8 = vld [vmem:[%s49_s11] ss:$0 sm:$0xff]  ;;  %s52_s15 = scalar_lea.vmem %s1468_s1, %s919_s24  ;;  %s1212_s28 = smov 64  }
  0x19   :  { %995 = vmatmul.mubr.msk.bf16.vlgmr.msra.gmra.mxu1 %vm149_vm1, %v199_v6  ;;  %v926_v9 = vld [vmem:[%s52_s15] ss:$0 sm:$0xff]  ;;  %s55_s17 = scalar_lea.vmem %s1468_s1, %s920_s25  ;;  %v112_v10 = vsel %vm111_vm2, %v47_v7, %v925_v8  ;;  %s884_s11 = sshll.u32 %s1215_s6, 4  ;;  %s885_s11 = int_to_ptr.vmem [resolvable:$true] %s884_s11 }
  0x1a   :  { %1007 = vmatpush3.bf16.msra.mxu1 %v1274_v0  ;;  %1010 = vmatprep.mubr.msk.bf16.mxu1 %vm1211_vm0, %v1210_v1  ;;  %v927_v11 = vld [vmem:[%s55_s17] ss:$0 sm:$0xff]  ;;  %s58_s20 = scalar_lea.vmem %s1468_s1, %s921_s2  ;;  %v114_v12 = vsel %vm113_vm3, %v112_v10, %v926_v9  ;;  %s894_s15 = sshll.u32 %s1217_s14, 4  ;;  %s1448_s15 = int_to_ptr.vmem [resolvable:$true] %s894_s15 }
  0x1b   :  { %1008 = vmatprep.subr.bf16.mxu1 %v1210_v1  ;;  %v928_v13 = vld [vmem:[%s58_s20] ss:$0 sm:$0xff]  ;;  %s61_s5 = scalar_lea.vmem %s1468_s1, %s922_s4  ;;  %v116_v14 = vsel %vm115_vm4, %v114_v12, %v927_v11  ;;  %s1143_s0 = scalar_lea.vmem %s885_s11, 16 }
  0x1c   :  { %v929_v15 = vld [vmem:[%s61_s5] ss:$0 sm:$0xff]  ;;  %s64_s25 = scalar_lea.vmem %s1468_s1, %s1306_s29  ;;  %v118_v16 = vsel %vm117_vm5, %v116_v14, %v928_v13  ;;  %p1144_p5 = scmp.ne.s32.totalorder %s885_s11, %s1143_s0 }
  0x1d   :  { %v930_v17 = vld [vmem:[%s64_s25] ss:$0 sm:$0xff]  ;;  %s67_s27 = scalar_lea.vmem %s1468_s1, %s924_s12  ;;  %v120_v18 = vsel %vm119_vm6, %v118_v16, %v929_v15  ;;  %s1216_s12 = smov [#allocation5]  }
  0x1e   :  { %1009 = vmatpush3.bf16.msra.mxu1 %v1285_v3  ;;  %v931_v19 = vld [vmem:[%s67_s27] ss:$0 sm:$0xff]  ;;  %v122_v20 = vsel %vm121_vm7, %v120_v18, %v930_v17  ;;  %s874_s13 = sshll.u32 %s1216_s12, 4  ;;  %s1147_s16 = scalar_lea.vmem %s885_s11, 32  ;;  %s875_s13 = int_to_ptr.vmem [resolvable:$true] %s874_s13 }
  0x1f   :  { %1022 = vmatprep.subr.bf16.mxu1 %v1210_v1  ;;  %v124_v21 = vsel %vm123_vm8, %v122_v20, %v931_v19  ;;  %p1148_p6 = scmp.lt.s32.totalorder %s885_s11, %s885_s11  ;;  %p1149_p7 = scmp.lt.s32.totalorder %s1147_s16, %s1143_s0 }
  0x20   :  { %v125_v22 = vpack.c.bf16 %v124_v21, %v124_v21 }
  0x21   :  { %p1150_p8 = por %p1149_p7, %p1148_p6 }
  0x22   :  { %987 = vmatmul.mubr.msk.bf16.vlgmr.msra.gmra.mxu0 %vm149_vm1, %v125_v22 }
  0x23   :  { %999 = vmatpush3.bf16.msra.mxu0 %v1274_v0  ;;  %1002 = vmatprep.mubr.msk.bf16.mxu0 %vm1211_vm0, %v1210_v1  ;;  %p1151_p9 = pnand %p1150_p8, %p1144_p5 }
  0x24   :  { %1000 = vmatprep.subr.bf16.mxu0 %v1210_v1 }
  0x27   :  { %1001 = vmatpush3.bf16.msra.mxu0 %v1285_v3 }
  0x28   :  { %1014 = vmatprep.subr.bf16.mxu0 %v1210_v1 }
  0xd9   :  { %v249_v23 = vpop.f32.mrf.mxu1 }
  0xdb   :  { %v996_v24 = vpop.f32.mrf.mxu1 }
  0xdd   :  { %v252_v25 = vpop.f32.mrf.mxu1 }
  0xdf   :  { %v997_v26 = vpop.f32.mrf.mxu1 }
  0xe2   :  { %v187_v28 = vpop.f32.mrf.mxu0 }
  0xe3   :  { %v1353_v29 = vadd.f32 %v932_v27, %v187_v28 }
  0xe4   :  { %v988_v30 = vpop.f32.mrf.mxu0 }
  0xe5   :  { %v255_v31 = vadd.f32 %v249_v23, %v1353_v29 }
  0xe6   :  { %v190_v32 = vpop.f32.mrf.mxu0 }
  0xe7   :  { %1067 = vtanh.f32 %v255_v31  ;;  %v939_v36 = vmul.f32 -1.442695, %v255_v31 }
  0xe8   :  { %v989_v33 = vpop.f32.mrf.mxu0 }
  0xe9   :  { %1069 = vpow2.f32 %v939_v36 }
  0xf4   :  { %v1068_v34 = vpop.eup %1067 }
  0xf5   :  { %273 = vrot.lane.b32.xlu0 %v1068_v34, %s1212_s28 }
  0xf6   :  { %v1070_v37 = vpop.eup %1069 }
  0xf7   :  { %v259_v38 = vadd.f32 1.0, %v1070_v37 }
  0xf9   :  { %268 = vrot.lane.b32.xlu0 %v940_v35, %s1213_s10  ;;  %1071 = vrcp.f32 %v259_v38 }
 0x106   :  { %v1072_v39 = vpop.eup %1071 }
 0x167   :  { %v274_v40 = vpop.permute.xlu0 %273 }
 0x168   :  { %v276_v41 = vmul.f32 %v1072_v39, %v274_v40 }
 0x16a   :  { %278 = vrot.lane.b32.xlu1 %v276_v41, %s1213_s10 }
 0x16b   :  { %v269_v42 = vpop.permute.xlu0 %268 }
 0x16c   :  { %v271_v43 = vmul.f32 %v1072_v39, %v269_v42 }
 0x1dc   :  { %v279_v44 = vpop.permute.xlu1 %278 }
 0x1dd   :  { %v281_v45 = vadd.f32 %v279_v44, %v271_v43 }
 0x1df   :  { %1073 = vtanh.f32 %v281_v45  ;;  %v347_v2 = vrot.slane %v281_v45, 7 }
 0x1ec   :  { %v1074_v46 = vpop.eup %1073 }
 0x1ed   :  { %284 = vrot.lane.b32.xlu1 %v1074_v46, %s1212_s28 }
 0x25f   :  { %v285_v47 = vpop.permute.xlu1 %284 }
 0x260   :  { %v1363_v48 = vmul.f32 %v1072_v39, %v285_v47 }
 0x262   :  { %v288_v49 = vpack.c.bf16 %v1363_v48, %v1363_v48 }
 0x264   :  { %290 = vrot.lane.b32.xlu0 %v288_v49, %s1213_s10 }
 0x2d6   :  { %v291_v50 = vpop.permute.xlu0 %290 }
 0x2d7   :  { %1003 = vmatmul.mubr.msk.bf16.vlgmr.msra.gmra.mxu0 %vm149_vm1, %v291_v50 }
 0x2d8   :  { %1015 = vmatpush3.bf16.msra.mxu0 %v1274_v0  ;;  %1018 = vmatprep.mubr.msk.bf16.mxu0 %vm1211_vm0, %v1210_v1 }
 0x2d9   :  { %1016 = vmatprep.subr.bf16.mxu0 %v1210_v1 }
 0x2dc   :  { %1017 = vmatpush3.bf16.msra.mxu0 %v1285_v3 }
 0x2dd   :  { %1030 = vmatprep.subr.bf16.mxu0 %v1210_v1 }
 0x397   :  { %v329_v51 = vpop.f32.mrf.mxu0 }
 0x398   :  { %v336_v52 = vrot.slane %v329_v51, 7 }
 0x399   :  { %v1004_v53 = vpop.f32.mrf.mxu0 }
 0x39a   :  { %v338_v54 = vadd.f32 %v336_v52, %v1353_v29 }
 0x39b   :  { %v332_v55 = vpop.f32.mrf.mxu0 }
 0x39c   :  { %1075 = vtanh.f32 %v338_v54  ;;  %v942_v58 = vmul.f32 -1.442695, %v338_v54 }
 0x39d   :  { %v1005_v56 = vpop.f32.mrf.mxu0 }
 0x39e   :  { %1077 = vpow2.f32 %v942_v58 }
 0x3a9   :  { %v1076_v57 = vpop.eup %1075 }
 0x3aa   :  { %351 = vrot.lane.b32.xlu1 %v1076_v57, %s1212_s28 }
 0x3ab   :  { %v1078_v59 = vpop.eup %1077 }
 0x3ac   :  { %v342_v60 = vadd.f32 1.0, %v1078_v59 }
 0x3ae   :  { %1079 = vrcp.f32 %v342_v60 }
 0x3bb   :  { %v1080_v61 = vpop.eup %1079 }
 0x3bc   :  { %v349_v4 = vmul.f32 %v1080_v61, %v347_v2 }
 0x41c   :  { %v352_v62 = vpop.permute.xlu1 %351 }
 0x41d   :  { %v354_v63 = vmul.f32 %v1080_v61, %v352_v62 }
 0x41f   :  { %356 = vrot.lane.b32.xlu0 %v354_v63, %s1213_s10 }
 0x491   :  { %v357_v5 = vpop.permute.xlu0 %356 }
 0x492   :  { %v359_v6 = vadd.f32 %v357_v5, %v349_v4 }
 0x494   :  { %1081 = vtanh.f32 %v359_v6  ;;  %v427_v26 = vrot.slane %v359_v6, 7 }
 0x4a1   :  { %v1082_v7 = vpop.eup %1081 }
 0x4a2   :  { %362 = vrot.lane.b32.xlu1 %v1082_v7, %s1212_s28 }
 0x514   :  { %v363_v8 = vpop.permute.xlu1 %362 }
 0x515   :  { %v365_v9 = vmul.f32 %v1080_v61, %v363_v8 }
 0x517   :  { %v366_v10 = vpack.c.bf16 %v365_v9, %v365_v9  ;;  %v845_v34 = vsel %vm111_vm2, %v1363_v48, %v365_v9 }
 0x519   :  { %v368_v11 = vshrl.u32 %v366_v10, 16 }
 0x51b   :  { %370 = vrot.lane.b32.xlu0 %v368_v11, %s1213_s10 }
 0x58d   :  { %v371_v12 = vpop.permute.xlu0 %370 }
 0x58e   :  { %1011 = vmatmul.mubr.msk.bf16.vlgmr.msra.gmra.mxu1 %vm149_vm1, %v371_v12 }
 0x58f   :  { %1023 = vmatpush3.bf16.msra.mxu1 %v1274_v0  ;;  %1026 = vmatprep.mubr.msk.bf16.mxu1 %vm1211_vm0, %v1210_v1 }
 0x590   :  { %1024 = vmatprep.subr.bf16.mxu1 %v1210_v1 }
 0x593   :  { %1025 = vmatpush3.bf16.msra.mxu1 %v1285_v3 }
 0x594   :  { %1038 = vmatprep.subr.bf16.mxu1 %v1210_v1 }
 0x64e   :  { %v409_v13 = vpop.f32.mrf.mxu1 }
 0x64f   :  { %v416_v14 = vrot.slane %v409_v13, 6 }
 0x650   :  { %v1012_v15 = vpop.f32.mrf.mxu1 }
 0x651   :  { %v418_v16 = vadd.f32 %v416_v14, %v1353_v29 }
 0x652   :  { %v412_v17 = vpop.f32.mrf.mxu1 }
 0x653   :  { %1083 = vtanh.f32 %v418_v16  ;;  %v944_v20 = vmul.f32 -1.442695, %v418_v16 }
 0x654   :  { %v1013_v18 = vpop.f32.mrf.mxu1 }
 0x655   :  { %1085 = vpow2.f32 %v944_v20 }
 0x660   :  { %v1084_v19 = vpop.eup %1083 }
 0x661   :  { %431 = vrot.lane.b32.xlu1 %v1084_v19, %s1212_s28 }
 0x662   :  { %v1086_v21 = vpop.eup %1085 }
 0x663   :  { %v422_v22 = vadd.f32 1.0, %v1086_v21 }
 0x665   :  { %1087 = vrcp.f32 %v422_v22 }
 0x672   :  { %v1088_v23 = vpop.eup %1087 }
 0x673   :  { %v429_v27 = vmul.f32 %v1088_v23, %v427_v26 }
 0x6d3   :  { %v432_v24 = vpop.permute.xlu1 %431 }
 0x6d4   :  { %v434_v25 = vmul.f32 %v1088_v23, %v432_v24 }
 0x6d6   :  { %436 = vrot.lane.b32.xlu0 %v434_v25, %s1213_s10 }
 0x748   :  { %v437_v28 = vpop.permute.xlu0 %436 }
 0x749   :  { %v439_v30 = vadd.f32 %v437_v28, %v429_v27 }
 0x74b   :  { %1089 = vtanh.f32 %v439_v30  ;;  %v506_v52 = vrot.slane %v439_v30, 7 }
 0x758   :  { %v1090_v31 = vpop.eup %1089 }
 0x759   :  { %442 = vrot.lane.b32.xlu1 %v1090_v31, %s1212_s28 }
 0x7cb   :  { %v443_v32 = vpop.permute.xlu1 %442 }
 0x7cc   :  { %v445_v33 = vmul.f32 %v1088_v23, %v443_v32 }
 0x7ce   :  { %v446_v35 = vpack.c.bf16 %v445_v33, %v445_v33  ;;  %v846_v36 = vsel %vm113_vm3, %v845_v34, %v445_v33 }
 0x7d0   :  { %v448_v37 = vrot.slane %v446_v35, 1 }
 0x7d2   :  { %449 = vrot.lane.b32.xlu0 %v448_v37, %s1213_s10 }
 0x844   :  { %v450_v38 = vpop.permute.xlu0 %449 }
 0x845   :  { %1019 = vmatmul.mubr.msk.bf16.vlgmr.msra.gmra.mxu0 %vm149_vm1, %v450_v38 }
 0x846   :  { %1031 = vmatpush3.bf16.msra.mxu0 %v1274_v0  ;;  %1034 = vmatprep.mubr.msk.bf16.mxu0 %vm1211_vm0, %v1210_v1 }
 0x847   :  { %1032 = vmatprep.subr.bf16.mxu0 %v1210_v1 }
 0x84a   :  { %1033 = vmatpush3.bf16.msra.mxu0 %v1285_v3 }
 0x84b   :  { %1046 = vmatprep.subr.bf16.mxu0 %v1210_v1 }
 0x905   :  { %v488_v39 = vpop.f32.mrf.mxu0 }
 0x906   :  { %v495_v40 = vrot.slane %v488_v39, 5 }
 0x907   :  { %v1020_v41 = vpop.f32.mrf.mxu0 }
 0x908   :  { %v497_v42 = vadd.f32 %v495_v40, %v1353_v29 }
 0x909   :  { %v491_v43 = vpop.f32.mrf.mxu0 }
 0x90a   :  { %1091 = vtanh.f32 %v497_v42  ;;  %v946_v46 = vmul.f32 -1.442695, %v497_v42 }
 0x90b   :  { %v1021_v44 = vpop.f32.mrf.mxu0 }
 0x90c   :  { %1093 = vpow2.f32 %v946_v46 }
 0x917   :  { %v1092_v45 = vpop.eup %1091 }
 0x918   :  { %510 = vrot.lane.b32.xlu1 %v1092_v45, %s1212_s28 }
 0x919   :  { %v1094_v47 = vpop.eup %1093 }
 0x91a   :  { %v501_v48 = vadd.f32 1.0, %v1094_v47 }
 0x91c   :  { %1095 = vrcp.f32 %v501_v48 }
 0x929   :  { %v1096_v49 = vpop.eup %1095 }
 0x92a   :  { %v508_v53 = vmul.f32 %v1096_v49, %v506_v52 }
 0x98a   :  { %v511_v50 = vpop.permute.xlu1 %510 }
 0x98b   :  { %v513_v51 = vmul.f32 %v1096_v49, %v511_v50 }
 0x98d   :  { %515 = vrot.lane.b32.xlu0 %v513_v51, %s1213_s10 }
 0x9ff   :  { %v516_v54 = vpop.permute.xlu0 %515 }
 0xa00   :  { %v518_v55 = vadd.f32 %v516_v54, %v508_v53 }
 0xa02   :  { %1097 = vtanh.f32 %v518_v55  ;;  %v587_v16 = vrot.slane %v518_v55, 7 }
 0xa0f   :  { %v1098_v56 = vpop.eup %1097 }
 0xa10   :  { %521 = vrot.lane.b32.xlu1 %v1098_v56, %s1212_s28 }
 0xa82   :  { %v522_v57 = vpop.permute.xlu1 %521 }
 0xa83   :  { %v524_v58 = vmul.f32 %v1096_v49, %v522_v57 }
 0xa85   :  { %v525_v59 = vpack.c.bf16 %v524_v58, %v524_v58  ;;  %v847_v60 = vsel %vm115_vm4, %v846_v36, %v524_v58 }
 0xa87   :  { %v527_v61 = vshrl.u32 %v525_v59, 16 }
 0xa89   :  { %v529_v62 = vrot.slane %v527_v61, 1 }
 0xa8b   :  { %530 = vrot.lane.b32.xlu0 %v529_v62, %s1213_s10 }
 0xafd   :  { %v531_v63 = vpop.permute.xlu0 %530 }
 0xafe   :  { %1027 = vmatmul.mubr.msk.bf16.vlgmr.msra.gmra.mxu1 %vm149_vm1, %v531_v63 }
 0xaff   :  { %1039 = vmatpush3.bf16.msra.mxu1 %v1274_v0  ;;  %1042 = vmatprep.mubr.msk.bf16.mxu1 %vm1211_vm0, %v1210_v1 }
 0xb00   :  { %1040 = vmatprep.subr.bf16.mxu1 %v1210_v1 }
 0xb03   :  { %1041 = vmatpush3.bf16.msra.mxu1 %v1285_v3 }
 0xbbe   :  { %v569_v2 = vpop.f32.mrf.mxu1 }
 0xbbf   :  { %v576_v4 = vrot.slane %v569_v2, 4 }
 0xbc0   :  { %v1028_v5 = vpop.f32.mrf.mxu1 }
 0xbc1   :  { %v578_v6 = vadd.f32 %v576_v4, %v1353_v29 }
 0xbc2   :  { %v572_v7 = vpop.f32.mrf.mxu1 }
 0xbc3   :  { %1099 = vtanh.f32 %v578_v6  ;;  %v948_v10 = vmul.f32 -1.442695, %v578_v6 }
 0xbc4   :  { %v1029_v8 = vpop.f32.mrf.mxu1 }
 0xbc5   :  { %1101 = vpow2.f32 %v948_v10 }
 0xbd0   :  { %v1100_v9 = vpop.eup %1099 }
 0xbd1   :  { %591 = vrot.lane.b32.xlu1 %v1100_v9, %s1212_s28 }
 0xbd2   :  { %v1102_v11 = vpop.eup %1101 }
 0xbd3   :  { %v582_v12 = vadd.f32 1.0, %v1102_v11 }
 0xbd5   :  { %1103 = vrcp.f32 %v582_v12 }
 0xbe2   :  { %v1104_v13 = vpop.eup %1103 }
 0xbe3   :  { %v589_v17 = vmul.f32 %v1104_v13, %v587_v16 }
 0xc43   :  { %v592_v14 = vpop.permute.xlu1 %591 }
 0xc44   :  { %v594_v15 = vmul.f32 %v1104_v13, %v592_v14 }
 0xc46   :  { %596 = vrot.lane.b32.xlu0 %v594_v15, %s1213_s10 }
 0xcb8   :  { %v597_v18 = vpop.permute.xlu0 %596 }
 0xcb9   :  { %v599_v19 = vadd.f32 %v597_v18, %v589_v17 }
 0xcbb   :  { %1105 = vtanh.f32 %v599_v19 }
 0xcc8   :  { %v1106_v20 = vpop.eup %1105 }
 0xcc9   :  { %602 = vrot.lane.b32.xlu1 %v1106_v20, %s1212_s28 }
 0xd3b   :  { %v603_v21 = vpop.permute.xlu1 %602 }
 0xd3c   :  { %v605_v22 = vmul.f32 %v1104_v13, %v603_v21 }
 0xd3e   :  { %v606_v23 = vpack.c.bf16 %v605_v22, %v605_v22  ;;  %v848_v24 = vsel %vm117_vm5, %v847_v60, %v605_v22 }
 0xd40   :  { %v608_v25 = vrot.slane %v606_v23, 2 }
 0xd42   :  { %609 = vrot.lane.b32.xlu0 %v608_v25, %s1213_s10 }
 0xdb4   :  { %v610_v26 = vpop.permute.xlu0 %609 }
 0xdb5   :  { %1035 = vmatmul.mubr.msk.bf16.vlgmr.msra.gmra.mxu0 %vm149_vm1, %v610_v26 }
 0xdb6   :  { %1047 = vmatpush3.bf16.msra.mxu0 %v1274_v0  ;;  %1050 = vmatprep.mubr.msk.bf16.mxu0 %vm1211_vm0, %v1210_v1 }
 0xdb7   :  { %1048 = vmatprep.subr.bf16.mxu0 %v1210_v1 }
 0xdba   :  { %1049 = vmatpush3.bf16.msra.mxu0 %v1285_v3  ;;  %v666_v3 = vrot.slane %v599_v19, 7 }
 0xe75   :  { %v648_v27 = vpop.f32.mrf.mxu0 }
 0xe76   :  { %v655_v28 = vrot.slane %v648_v27, 3 }
 0xe77   :  { %v1036_v30 = vpop.f32.mrf.mxu0 }
 0xe78   :  { %v657_v31 = vadd.f32 %v655_v28, %v1353_v29 }
 0xe79   :  { %v651_v32 = vpop.f32.mrf.mxu0 }
 0xe7a   :  { %1107 = vtanh.f32 %v657_v31  ;;  %v950_v35 = vmul.f32 -1.442695, %v657_v31 }
 0xe7b   :  { %v1037_v33 = vpop.f32.mrf.mxu0 }
 0xe7c   :  { %1109 = vpow2.f32 %v950_v35 }
 0xe87   :  { %v1108_v34 = vpop.eup %1107 }
 0xe88   :  { %670 = vrot.lane.b32.xlu1 %v1108_v34, %s1212_s28 }
 0xe89   :  { %v1110_v0 = vpop.eup %1109 }
 0xe8a   :  { %v661_v36 = vadd.f32 1.0, %v1110_v0 }
 0xe8c   :  { %1111 = vrcp.f32 %v661_v36 }
 0xe99   :  { %v1112_v37 = vpop.eup %1111 }
 0xe9a   :  { %v668_v39 = vmul.f32 %v1112_v37, %v666_v3 }
 0xefa   :  { %v671_v1 = vpop.permute.xlu1 %670 }
 0xefb   :  { %v673_v38 = vmul.f32 %v1112_v37, %v671_v1 }
 0xefd   :  { %675 = vrot.lane.b32.xlu0 %v673_v38, %s1213_s10 }
 0xf6f   :  { %v676_v40 = vpop.permute.xlu0 %675 }
 0xf70   :  { %v678_v41 = vadd.f32 %v676_v40, %v668_v39 }
 0xf72   :  { %1113 = vtanh.f32 %v678_v41  ;;  %v747_v63 = vrot.slane %v678_v41, 7 }
 0xf7f   :  { %v1114_v42 = vpop.eup %1113 }
 0xf80   :  { %681 = vrot.lane.b32.xlu1 %v1114_v42, %s1212_s28 }
 0xff2   :  { %v682_v43 = vpop.permute.xlu1 %681 }
 0xff3   :  { %v684_v44 = vmul.f32 %v1112_v37, %v682_v43 }
 0xff5   :  { %v685_v45 = vpack.c.bf16 %v684_v44, %v684_v44  ;;  %v849_v46 = vsel %vm119_vm6, %v848_v24, %v684_v44 }
 0xff7   :  { %v687_v47 = vshrl.u32 %v685_v45, 16 }
 0xff9   :  { %v689_v48 = vrot.slane %v687_v47, 2 }
 0xffb   :  { %690 = vrot.lane.b32.xlu0 %v689_v48, %s1213_s10 }
0x106d   :  { %v691_v49 = vpop.permute.xlu0 %690 }
0x106e   :  { %1043 = vmatmul.mubr.msk.bf16.vlgmr.msra.gmra.mxu1 %vm149_vm1, %v691_v49 }
0x112e   :  { %v729_v50 = vpop.f32.mrf.mxu1 }
0x112f   :  { %v736_v51 = vrot.slane %v729_v50, 2 }
0x1130   :  { %v1044_v52 = vpop.f32.mrf.mxu1 }
0x1131   :  { %v738_v53 = vadd.f32 %v736_v51, %v1353_v29 }
0x1132   :  { %v732_v54 = vpop.f32.mrf.mxu1 }
0x1133   :  { %1115 = vtanh.f32 %v738_v53  ;;  %v952_v57 = vmul.f32 -1.442695, %v738_v53 }
0x1134   :  { %v1045_v55 = vpop.f32.mrf.mxu1 }
0x1135   :  { %1117 = vpow2.f32 %v952_v57 }
0x1140   :  { %v1116_v56 = vpop.eup %1115 }
0x1141   :  { %751 = vrot.lane.b32.xlu1 %v1116_v56, %s1212_s28 }
0x1142   :  { %v1118_v58 = vpop.eup %1117 }
0x1143   :  { %v742_v59 = vadd.f32 1.0, %v1118_v58 }
0x1145   :  { %1119 = vrcp.f32 %v742_v59 }
0x1152   :  { %v1120_v60 = vpop.eup %1119 }
0x1153   :  { %v749_v2 = vmul.f32 %v1120_v60, %v747_v63 }
0x11b3   :  { %v752_v61 = vpop.permute.xlu1 %751 }
0x11b4   :  { %v754_v62 = vmul.f32 %v1120_v60, %v752_v61 }
0x11b6   :  { %756 = vrot.lane.b32.xlu0 %v754_v62, %s1213_s10 }
0x1228   :  { %v757_v4 = vpop.permute.xlu0 %756 }
0x1229   :  { %v759_v5 = vadd.f32 %v757_v4, %v749_v2 }
0x122b   :  { %1121 = vtanh.f32 %v759_v5  ;;  %v826_v26 = vrot.slane %v759_v5, 7 }
0x1238   :  { %v1122_v6 = vpop.eup %1121 }
0x1239   :  { %762 = vrot.lane.b32.xlu1 %v1122_v6, %s1212_s28 }
0x12ab   :  { %v763_v7 = vpop.permute.xlu1 %762 }
0x12ac   :  { %v765_v8 = vmul.f32 %v1120_v60, %v763_v7 }
0x12ae   :  { %v766_v9 = vpack.c.bf16 %v765_v8, %v765_v8  ;;  %v850_v10 = vsel %vm121_vm7, %v849_v46, %v765_v8 }
0x12b0   :  { %v768_v11 = vrot.slane %v766_v9, 3 }
0x12b2   :  { %769 = vrot.lane.b32.xlu0 %v768_v11, %s1213_s10 }
0x1324   :  { %v770_v12 = vpop.permute.xlu0 %769 }
0x1325   :  { %1051 = vmatmul.mubr.msk.bf16.vlgmr.msra.gmra.mxu0 %vm149_vm1, %v770_v12 }
0x13e5   :  { %v808_v13 = vpop.f32.mrf.mxu0 }
0x13e6   :  { %v815_v14 = vrot.slane %v808_v13, 1 }
0x13e7   :  { %v1052_v15 = vpop.f32.mrf.mxu0 }
0x13e8   :  { %v817_v16 = vadd.f32 %v815_v14, %v1353_v29 }
0x13e9   :  { %v811_v17 = vpop.f32.mrf.mxu0 }
0x13ea   :  { %1123 = vtanh.f32 %v817_v16  ;;  %v954_v20 = vmul.f32 -1.442695, %v817_v16 }
0x13eb   :  { %v1053_v18 = vpop.f32.mrf.mxu0 }
0x13ec   :  { %1125 = vpow2.f32 %v954_v20 }
0x13f7   :  { %v1124_v19 = vpop.eup %1123 }
0x13f8   :  { %830 = vrot.lane.b32.xlu1 %v1124_v19, %s1212_s28 }
0x13f9   :  { %v1126_v21 = vpop.eup %1125 }
0x13fa   :  { %v821_v22 = vadd.f32 1.0, %v1126_v21 }
0x13fc   :  { %1127 = vrcp.f32 %v821_v22 }
0x1409   :  { %v1128_v23 = vpop.eup %1127 }
0x140a   :  { %v828_v27 = vmul.f32 %v1128_v23, %v826_v26 }
0x146a   :  { %v831_v24 = vpop.permute.xlu1 %830 }
0x146b   :  { %v833_v25 = vmul.f32 %v1128_v23, %v831_v24 }
0x146d   :  { %835 = vrot.lane.b32.xlu0 %v833_v25, %s1213_s10 }
0x14df   :  { %v836_v28 = vpop.permute.xlu0 %835 }
0x14e0   :  { %v838_v29 = vadd.f32 %v836_v28, %v828_v27 }
0x14e2   :  { %1129 = vtanh.f32 %v838_v29 }
0x14ef   :  { %v1130_v30 = vpop.eup %1129 }
0x14f0   :  { %841 = vrot.lane.b32.xlu1 %v1130_v30, %s1212_s28 }
0x1562   :  { %v842_v31 = vpop.permute.xlu1 %841 }
0x1563   :  { %v844_v32 = vmul.f32 %v1128_v23, %v842_v31 }
0x1565   :  { %858 = vrot.lane.b32.xlu0 %v844_v32, %s1213_s10  ;;  %v851_v33 = vsel %vm123_vm8, %v850_v10, %v844_v32 }
0x1566   :  { %853 = vrot.lane.b32.xlu1 %v851_v33, %s1213_s10 }
0x1569   :  { %864 = vrot.lane.b32.xlu0 %v838_v29, %s1214_s3 }
0x15d7   :  { %v859_v34 = vpop.permute.xlu0 %858 }
0x15d8   :  { %v854_v35 = vpop.permute.xlu1 %853  ;;  %862 = vst.msk [vmem:[#allocation6 - $0x7] sm:$0x80] %vm861_vm9, %v859_v34 }
0x15d9   :  { %856 = vst.msk [vmem:[#allocation5] sm:$0xff] %vm149_vm1, %v854_v35 }
0x15da   :  { %1154 = shalt.err (!%p1151_p9)
}
0x15db   :  { %887 = dma.vmem_to_hbm [thread:$0]  %s885_s11, 16, %s1475_s8, [#allocation7]  }
0x15dc   :  { %s1163_s19 = scalar_lea.vmem %s875_s13, 128  ;;  %p1168_p11 = scmp.lt.s32.totalorder %s875_s13, %s875_s13 }
0x15dd   :  { %p1164_p10 = scmp.ne.s32.totalorder %s875_s13, %s1163_s19  ;;  %p1169_p12 = scmp.lt.s32.totalorder %s1163_s19, %s1163_s19 }
0x15df   :  { %p1170_p13 = por %p1169_p12, %p1168_p11 }
0x15e1   :  { %p1171_p0 = pnand %p1170_p13, %p1164_p10 }
0x15e3   :  { %1174 = shalt.err (!%p1171_p0)
}
0x15e4   :  { %877 = dma.vmem_to_hbm [thread:$0]  %s875_s13, 128, %s1474_s7, [#allocation3]   ;;  %v865_v0 = vpop.permute.xlu0 %864 }
0x15e5   :  { %867 = vst.msk [vmem:[#allocation8 - $0x7] sm:$0x80] %vm861_vm9, %v865_v0  ;;  %s1183_s22 = scalar_lea.vmem %s1448_s15, 16  ;;  %s1187_s8 = scalar_lea.vmem %s1448_s15, 32 }
0x15e6   :  { %p1184_p1 = scmp.ne.s32.totalorder %s1448_s15, %s1183_s22  ;;  %p1188_p2 = scmp.lt.s32.totalorder %s1448_s15, %s1448_s15 }
0x15e7   :  { %p1189_p3 = scmp.lt.s32.totalorder %s1187_s8, %s1183_s22 }
0x15e9   :  { %p1190_p4 = por %p1189_p3, %p1188_p2 }
0x15eb   :  { %p1191_p5 = pnand %p1190_p4, %p1184_p1 }
0x15ed   :  { %1194 = shalt.err (!%p1191_p5)
}
0x15ee   :  { %897 = dma.vmem_to_hbm [thread:$0]  %s1448_s15, 16, %s1476_s9, [#allocation7]  }
0x15ef   :  { %1205 = dma.done.wait [#allocation3], 128  }
0x15f0   :  { %1206 = vsyncadd [#allocation3], 4294967168 }
0x15f1   :  { %1207 = dma.done.wait [#allocation7], 32  }
0x15f2   :  { %1208 = vsyncadd [#allocation7], 4294967264 }
0x15f3   :  { %907 = vsyncpa [#allocation3], 1 }
0x15f4   :  { %908 = vsyncpa [#allocation7], 1 }
0x15f5   :  { %909 = vsyncpa [#allocation4], 1 }

</bundles_post_ra>
